<compile_context>
chip_gen: v6e
topology: v6e:2x2x1
jax: 0.10.0
libtpu: 0.0.40
codegen_flags: <defaults>
</compile_context>

<pallas_src>
import math

import jax
import jax.numpy as jnp
from jax import lax
from jax.experimental import pallas as pl
from jax.experimental.pallas import tpu as pltpu


def _head_flash_kernel(xq_ref, xkv_ref, w_ref, o_ref, q_ref, m_ref, l_ref, acc_ref):
    # xq_ref: (1, tq, d), xkv_ref: (1, tk, d), w_ref: (3, d, dh), o_ref: (1, tq, dh)
    # scratch: q_ref (tq, dh) compute-dtype, m_ref/l_ref (tq, 1) f32, acc_ref (tq, dh) f32
    ki = pl.program_id(2)
    cdt = q_ref.dtype  # matmul compute dtype (bf16 in production, f32 for the f32 test)

    @pl.when(ki == 0)
    def _init():
        m_ref[...] = jnp.full(m_ref.shape, -jnp.inf, dtype=m_ref.dtype)
        l_ref[...] = jnp.zeros(l_ref.shape, dtype=l_ref.dtype)
        acc_ref[...] = jnp.zeros(acc_ref.shape, dtype=acc_ref.dtype)
        # Q projection depends only on (b, qi): compute once and reuse across the kv
        # loop.  1/sqrt(dh) is already folded into w_ref[0] by the wrapper.
        q_ref[...] = jnp.dot(
            xq_ref[0], w_ref[0], preferred_element_type=jnp.float32
        ).astype(cdt)

    xkv = xkv_ref[0]                                                  # (tk, d)
    k = jnp.dot(xkv, w_ref[1], preferred_element_type=jnp.float32)    # (tk, dh) f32
    v = jnp.dot(xkv, w_ref[2], preferred_element_type=jnp.float32)    # (tk, dh) f32

    # q @ k^T without an explicit transpose: contract the last dims.  Matmul inputs
    # in the compute dtype (bf16 MXU path when requested), f32 accumulation.
    s = lax.dot_general(
        q_ref[...], k.astype(cdt),
        dimension_numbers=(((1,), (1,)), ((), ())),
        preferred_element_type=jnp.float32,
    )  # (tq, tk) f32

    # Online softmax update -- all stats in f32 (keep it that way on v5e).
    m_prev = m_ref[...]
    m_new = jnp.maximum(m_prev, jnp.max(s, axis=-1, keepdims=True))
    alpha = jnp.exp(m_prev - m_new)          # exp(-inf) == 0 on the first kv step
    p = jnp.exp(s - m_new)
    l_ref[...] = alpha * l_ref[...] + jnp.sum(p, axis=-1, keepdims=True)
    acc_ref[...] = alpha * acc_ref[...] + jnp.dot(
        p.astype(cdt), v.astype(cdt), preferred_element_type=jnp.float32)
    m_ref[...] = m_new

    @pl.when(ki == pl.num_programs(2) - 1)
    def _finalize():
        # Exact reciprocal (approx=True cost ~3e-2 error in the harness); one
        # (tq, 1) divide per query tile is negligible.
        inv_l = pl.reciprocal(l_ref[...], approx=False)
        o_ref[0] = (acc_ref[...] * inv_l).astype(o_ref.dtype)


def _pick_tile(S):
    # Largest 128-aligned tile that divides S, else fall back to the full extent
    # (a full-extent block is always legal).
    for t in (512, 256, 128):
        if S % t == 0:
            return t
    return S


def head_forward(x, w, dh, *, compute_dtype=None):
    """x: (B, S, d), w: (d, 3*dh) -> (B, S, dh). Matches the PyTorch Head.forward.

    compute_dtype controls the dtype fed to the MXU matmuls (accumulation is always
    f32).  Use jnp.bfloat16 for production throughput; default keeps x's dtype.
    """
    B, S, d = x.shape
    assert w.shape == (d, 3 * dh)
    if compute_dtype is None:
        compute_dtype = x.dtype

    scale = 1.0 / math.sqrt(dh)
    # Lane-dense (d, dh) slabs; fold 1/sqrt(dh) into the q slab in f32 before any cast.
    wq = w[:, :dh] * scale
    wk = w[:, dh:2 * dh]
    wv = w[:, 2 * dh:3 * dh]
    w3 = jnp.stack([wq, wk, wv], axis=0).astype(compute_dtype)   # (3, d, dh)
    xc = x.astype(compute_dtype)

    tq = _pick_tile(S)
    tk = _pick_tile(S)
    grid = (B, S // tq, S // tk)

    return pl.pallas_call(
        _head_flash_kernel,
        out_shape=jax.ShapeDtypeStruct((B, S, dh), x.dtype),
        grid_spec=pltpu.PrefetchScalarGridSpec(
            num_scalar_prefetch=0,
            grid=grid,
            in_specs=[
                pl.BlockSpec((1, tq, d), lambda b, qi, ki: (b, qi, 0)),  # query rows
                pl.BlockSpec((1, tk, d), lambda b, qi, ki: (b, ki, 0)),  # kv rows
                pl.BlockSpec((3, d, dh), lambda b, qi, ki: (0, 0, 0)),   # weights (resident)
            ],
            out_specs=pl.BlockSpec((1, tq, dh), lambda b, qi, ki: (b, qi, 0)),
            scratch_shapes=[
                pltpu.VMEM((tq, dh), compute_dtype),  # cached (scaled) Q projection
                pltpu.VMEM((tq, 1), jnp.float32),     # running max m
                pltpu.VMEM((tq, 1), jnp.float32),     # running denom l
                pltpu.VMEM((tq, dh), jnp.float32),    # running output accumulator
            ],
        ),
        compiler_params=pltpu.CompilerParams(
            dimension_semantics=("parallel", "parallel", "arbitrary"),
        ),
    )(xc, xc, w3)


def head_reference(x, w, dh):
    """Pure-JAX reference mirroring the PyTorch forward exactly."""
    qkv = x @ w
    q = qkv[..., :dh]
    k = qkv[..., dh:2 * dh]
    v = qkv[..., 2 * dh:3 * dh]
    scores = jnp.einsum("bsd,btd->bst", q, k) / math.sqrt(dh)
    p = jax.nn.softmax(scores, axis=-1)
    return p @ v


if __name__ == "__main__":
    # Small shapes consistent with the module: B=2, S=8, d=32, dh=16.
    B, S, d, dh = 2, 8, 32, 16

    key = jax.random.PRNGKey(0)
    kx, kw = jax.random.split(key)
    # Scale x so scores are O(1): keeps the comparison insensitive to the matmul
    # precision mode of the pure-JAX reference (bf16-pass f32 matmuls on TPU) and to
    # the bf16 compute-dtype path below.
    x = 0.1 * jax.random.normal(kx, (B, S, d), dtype=jnp.float32)
    w = jax.random.normal(kw, (d, 3 * dh), dtype=jnp.float32)  # nn.Parameter(torch.randn(d, 3*dh))

    ref = head_reference(x, w, dh)

    # 1) f32 compute path: strict check against the PyTorch-equivalent reference.
    out = head_forward(x, w, dh)
    jax.block_until_ready(out)
    assert out.shape == (B, S, dh)
    err = float(jnp.max(jnp.abs(out - ref)))
    assert jnp.allclose(out, ref, atol=2e-2, rtol=2e-2), err

    # 2) bf16 MXU path (the production configuration from the perf review): looser
    #    tolerance covers bf16 rounding of x/w/q/k/v/p around the f32-accumulated matmuls.
    out_bf16 = head_forward(x, w, dh, compute_dtype=jnp.bfloat16)
    jax.block_until_ready(out_bf16)
    err_bf16 = float(jnp.max(jnp.abs(out_bf16 - ref)))
    assert jnp.allclose(out_bf16, ref, atol=1e-1, rtol=1e-1), err_bf16

    print("KERNEL_OK")
</pallas_src>

<mosaic_0001>
module attributes {stable_mosaic.version = 11 : i64} {
  func.func @_head_flash_kernel(%arg0: i32, %arg1: i32, %arg2: i32, %arg3: memref<1x8x32xf32, #tpu.memory_space<vmem>>, %arg4: memref<1x8x32xf32, #tpu.memory_space<vmem>>, %arg5: memref<3x32x16xf32, #tpu.memory_space<vmem>>, %arg6: memref<1x8x16xf32, #tpu.memory_space<vmem>>, %arg7: memref<8x16xf32, #tpu.memory_space<vmem>>, %arg8: memref<8x1xf32, #tpu.memory_space<vmem>>, %arg9: memref<8x1xf32, #tpu.memory_space<vmem>>, %arg10: memref<8x16xf32, #tpu.memory_space<vmem>>) attributes {dimension_semantics = [#tpu.dimension_semantics<parallel>, #tpu.dimension_semantics<parallel>, #tpu.dimension_semantics<arbitrary>], iteration_bounds = array<i64: 2, 1, 1>, scalar_prefetch = 0 : i64, scratch_operands = 4 : i64, tpu.core_type = #tpu.core_type<tc>, window_params = [{transform_indices = @transform_0, window_bounds = array<i64: 1, 8, 32>}, {transform_indices = @transform_1, window_bounds = array<i64: 1, 8, 32>}, {pipeline_mode = #tpu.pipeline_mode<synchronous>, transform_indices = @transform_2, window_bounds = array<i64: 3, 32, 16>}, {transform_indices = @transform_3, window_bounds = array<i64: 1, 8, 16>}]} {
    %c0_i32 = arith.constant 0 : i32
    %0 = arith.cmpi eq, %arg2, %c0_i32 : i32
    %1 = arith.extui %0 : i1 to i32
    %c0_i32_0 = arith.constant 0 : i32
    %2 = arith.cmpi ne, %1, %c0_i32_0 : i32
    scf.if %2 {
      %cst_28 = arith.constant 0xFF800000 : f32
      %38 = vector.broadcast %cst_28 : f32 to vector<8x1xf32>
      %c0_29 = arith.constant 0 : index
      %c0_30 = arith.constant 0 : index
      %39 = vector.load %arg8[%c0_29, %c0_30] : memref<8x1xf32, #tpu.memory_space<vmem>>, vector<8x1xf32>
      tpu.vector_store %arg8[%c0_29, %c0_30], %38 {strides = array<i32>} : memref<8x1xf32, #tpu.memory_space<vmem>>, vector<8x1xf32>,
      %cst_31 = arith.constant 0.000000e+00 : f32
      %40 = vector.broadcast %cst_31 : f32 to vector<8x1xf32>
      %c0_32 = arith.constant 0 : index
      %c0_33 = arith.constant 0 : index
      %41 = vector.load %arg9[%c0_32, %c0_33] : memref<8x1xf32, #tpu.memory_space<vmem>>, vector<8x1xf32>
      tpu.vector_store %arg9[%c0_32, %c0_33], %40 {strides = array<i32>} : memref<8x1xf32, #tpu.memory_space<vmem>>, vector<8x1xf32>,
      %cst_34 = arith.constant 0.000000e+00 : f32
      %42 = vector.broadcast %cst_34 : f32 to vector<8x16xf32>
      %c0_35 = arith.constant 0 : index
      %c0_36 = arith.constant 0 : index
      %43 = vector.load %arg10[%c0_35, %c0_36] : memref<8x16xf32, #tpu.memory_space<vmem>>, vector<8x16xf32>
      tpu.vector_store %arg10[%c0_35, %c0_36], %42 {strides = array<i32>} : memref<8x16xf32, #tpu.memory_space<vmem>>, vector<8x16xf32>,
      %c0_37 = arith.constant 0 : index
      %c0_38 = arith.constant 0 : index
      %c0_39 = arith.constant 0 : index
      %44 = vector.load %arg3[%c0_37, %c0_38, %c0_39] : memref<1x8x32xf32, #tpu.memory_space<vmem>>, vector<1x8x32xf32>
      %45 = vector.shape_cast %44 : vector<1x8x32xf32> to vector<8x32xf32>
      %c0_40 = arith.constant 0 : index
      %c0_41 = arith.constant 0 : index
      %c0_42 = arith.constant 0 : index
      %46 = vector.load %arg5[%c0_40, %c0_41, %c0_42] : memref<3x32x16xf32, #tpu.memory_space<vmem>>, vector<1x32x16xf32>
      %47 = vector.shape_cast %46 : vector<1x32x16xf32> to vector<32x16xf32>
      %cst_43 = arith.constant dense<0.000000e+00> : vector<8x16xf32>
      %48 = tpu.matmul %45, %47, %cst_43 {dimension_numbers = #tpu.dot_dimension_numbers<[1], [0], [0], [1], [0, 0, 1, 1], [], []>} : vector<8x32xf32>, vector<32x16xf32>, vector<8x16xf32> -> vector<8x16xf32>
      %c0_44 = arith.constant 0 : index
      %c0_45 = arith.constant 0 : index
      %49 = vector.load %arg7[%c0_44, %c0_45] : memref<8x16xf32, #tpu.memory_space<vmem>>, vector<8x16xf32>
      tpu.vector_store %arg7[%c0_44, %c0_45], %48 {strides = array<i32>} : memref<8x16xf32, #tpu.memory_space<vmem>>, vector<8x16xf32>,
    } else {
    }
    %c0 = arith.constant 0 : index
    %c0_1 = arith.constant 0 : index
    %c0_2 = arith.constant 0 : index
    %3 = vector.load %arg4[%c0, %c0_1, %c0_2] : memref<1x8x32xf32, #tpu.memory_space<vmem>>, vector<1x8x32xf32>
    %4 = vector.shape_cast %3 : vector<1x8x32xf32> to vector<8x32xf32>
    %c1 = arith.constant 1 : index
    %c0_3 = arith.constant 0 : index
    %c0_4 = arith.constant 0 : index
    %5 = vector.load %arg5[%c1, %c0_3, %c0_4] : memref<3x32x16xf32, #tpu.memory_space<vmem>>, vector<1x32x16xf32>
    %6 = vector.shape_cast %5 : vector<1x32x16xf32> to vector<32x16xf32>
    %cst = arith.constant dense<0.000000e+00> : vector<8x16xf32>
    %7 = tpu.matmul %4, %6, %cst {dimension_numbers = #tpu.dot_dimension_numbers<[1], [0], [0], [1], [0, 0, 1, 1], [], []>} : vector<8x32xf32>, vector<32x16xf32>, vector<8x16xf32> -> vector<8x16xf32>
    %c2 = arith.constant 2 : index
    %c0_5 = arith.constant 0 : index
    %c0_6 = arith.constant 0 : index
    %8 = vector.load %arg5[%c2, %c0_5, %c0_6] : memref<3x32x16xf32, #tpu.memory_space<vmem>>, vector<1x32x16xf32>
    %9 = vector.shape_cast %8 : vector<1x32x16xf32> to vector<32x16xf32>
    %cst_7 = arith.constant dense<0.000000e+00> : vector<8x16xf32>
    %10 = tpu.matmul %4, %9, %cst_7 {dimension_numbers = #tpu.dot_dimension_numbers<[1], [0], [0], [1], [0, 0, 1, 1], [], []>} : vector<8x32xf32>, vector<32x16xf32>, vector<8x16xf32> -> vector<8x16xf32>
    %c0_8 = arith.constant 0 : index
    %c0_9 = arith.constant 0 : index
    %11 = vector.load %arg7[%c0_8, %c0_9] : memref<8x16xf32, #tpu.memory_space<vmem>>, vector<8x16xf32>
    %cst_10 = arith.constant dense<0.000000e+00> : vector<8x8xf32>
    %12 = tpu.matmul %11, %7, %cst_10 {dimension_numbers = #tpu.dot_dimension_numbers<[1], [1], [0], [0], [0, 0, 1, 0], [], []>} : vector<8x16xf32>, vector<8x16xf32>, vector<8x8xf32> -> vector<8x8xf32>
    %c0_11 = arith.constant 0 : index
    %c0_12 = arith.constant 0 : index
    %13 = vector.load %arg8[%c0_11, %c0_12] : memref<8x1xf32, #tpu.memory_space<vmem>>, vector<8x1xf32>
    %cst_13 = arith.constant dense<0xFF800000> : vector<8xf32>
    %14 = vector.multi_reduction <maximumf>, %12, %cst_13 [1] : vector<8x8xf32> to vector<8xf32>
    %15 = vector.shape_cast %14 : vector<8xf32> to vector<8x1xf32>
    %16 = arith.maximumf %13, %15 : vector<8x1xf32>
    %17 = arith.subf %13, %16 : vector<8x1xf32>
    %18 = math.exp %17 : vector<8x1xf32>
    %19 = vector.broadcast %16 : vector<8x1xf32> to vector<8x8xf32>
    %20 = arith.subf %12, %19 : vector<8x8xf32>
    %21 = math.exp %20 : vector<8x8xf32>
    %c0_14 = arith.constant 0 : index
    %c0_15 = arith.constant 0 : index
    %22 = vector.load %arg9[%c0_14, %c0_15] : memref<8x1xf32, #tpu.memory_space<vmem>>, vector<8x1xf32>
    %23 = arith.mulf %18, %22 : vector<8x1xf32>
    %cst_16 = arith.constant dense<0.000000e+00> : vector<8xf32>
    %24 = vector.multi_reduction <add>, %21, %cst_16 [1] : vector<8x8xf32> to vector<8xf32>
    %25 = vector.shape_cast %24 : vector<8xf32> to vector<8x1xf32>
    %26 = arith.addf %23, %25 : vector<8x1xf32>
    %c0_17 = arith.constant 0 : index
    %c0_18 = arith.constant 0 : index
    %27 = vector.load %arg9[%c0_17, %c0_18] : memref<8x1xf32, #tpu.memory_space<vmem>>, vector<8x1xf32>
    tpu.vector_store %arg9[%c0_17, %c0_18], %26 {strides = array<i32>} : memref<8x1xf32, #tpu.memory_space<vmem>>, vector<8x1xf32>,
    %c0_19 = arith.constant 0 : index
    %c0_20 = arith.constant 0 : index
    %28 = vector.load %arg10[%c0_19, %c0_20] : memref<8x16xf32, #tpu.memory_space<vmem>>, vector<8x16xf32>
    %29 = vector.broadcast %18 : vector<8x1xf32> to vector<8x16xf32>
    %30 = arith.mulf %29, %28 : vector<8x16xf32>
    %cst_21 = arith.constant dense<0.000000e+00> : vector<8x16xf32>
    %31 = tpu.matmul %21, %10, %cst_21 {dimension_numbers = #tpu.dot_dimension_numbers<[1], [0], [0], [1], [0, 0, 1, 1], [], []>} : vector<8x8xf32>, vector<8x16xf32>, vector<8x16xf32> -> vector<8x16xf32>
    %32 = arith.addf %30, %31 : vector<8x16xf32>
    %c0_22 = arith.constant 0 : index
    %c0_23 = arith.constant 0 : index
    %33 = vector.load %arg10[%c0_22, %c0_23] : memref<8x16xf32, #tpu.memory_space<vmem>>, vector<8x16xf32>
    tpu.vector_store %arg10[%c0_22, %c0_23], %32 {strides = array<i32>} : memref<8x16xf32, #tpu.memory_space<vmem>>, vector<8x16xf32>,
    %c0_24 = arith.constant 0 : index
    %c0_25 = arith.constant 0 : index
    %34 = vector.load %arg8[%c0_24, %c0_25] : memref<8x1xf32, #tpu.memory_space<vmem>>, vector<8x1xf32>
    tpu.vector_store %arg8[%c0_24, %c0_25], %16 {strides = array<i32>} : memref<8x1xf32, #tpu.memory_space<vmem>>, vector<8x1xf32>,
    %c0_i32_26 = arith.constant 0 : i32
    %35 = arith.cmpi eq, %arg2, %c0_i32_26 : i32
    %36 = arith.extui %35 : i1 to i32
    %c0_i32_27 = arith.constant 0 : i32
    %37 = arith.cmpi ne, %36, %c0_i32_27 : i32
    scf.if %37 {
      %c0_28 = arith.constant 0 : index
      %c0_29 = arith.constant 0 : index
      %38 = vector.load %arg9[%c0_28, %c0_29] : memref<8x1xf32, #tpu.memory_space<vmem>>, vector<8x1xf32>
      %39 = tpu.reciprocal %38 : vector<8x1xf32> -> vector<8x1xf32>
      %c0_30 = arith.constant 0 : index
      %c0_31 = arith.constant 0 : index
      %40 = vector.load %arg10[%c0_30, %c0_31] : memref<8x16xf32, #tpu.memory_space<vmem>>, vector<8x16xf32>
      %41 = vector.broadcast %39 : vector<8x1xf32> to vector<8x16xf32>
      %42 = arith.mulf %40, %41 : vector<8x16xf32>
      %c0_32 = arith.constant 0 : index
      %c0_33 = arith.constant 0 : index
      %c0_34 = arith.constant 0 : index
      %43 = vector.load %arg6[%c0_32, %c0_33, %c0_34] : memref<1x8x16xf32, #tpu.memory_space<vmem>>, vector<1x8x16xf32>
      %44 = vector.shape_cast %43 : vector<1x8x16xf32> to vector<8x16xf32>
      %45 = vector.shape_cast %42 : vector<8x16xf32> to vector<1x8x16xf32>
      tpu.vector_store %arg6[%c0_32, %c0_33, %c0_34], %45 {strides = array<i32>} : memref<1x8x16xf32, #tpu.memory_space<vmem>>, vector<1x8x16xf32>,
    } else {
    }
    return
  }
  func.func @transform_0(%arg0: i32, %arg1: i32, %arg2: i32) -> (i32, i32, i32) {
    %c0_i32 = arith.constant 0 : i32
    %c0_i32_0 = arith.constant 0 : i32
    return %arg0, %arg1, %c0_i32 : i32, i32, i32
  }
  func.func @transform_1(%arg0: i32, %arg1: i32, %arg2: i32) -> (i32, i32, i32) {
    %c0_i32 = arith.constant 0 : i32
    %c0_i32_0 = arith.constant 0 : i32
    return %arg0, %arg2, %c0_i32 : i32, i32, i32
  }
  func.func @transform_2(%arg0: i32, %arg1: i32, %arg2: i32) -> (i32, i32, i32) {
    %c0_i32 = arith.constant 0 : i32
    %c0_i32_0 = arith.constant 0 : i32
    %c0_i32_1 = arith.constant 0 : i32
    %c0_i32_2 = arith.constant 0 : i32
    return %c0_i32, %c0_i32_0, %c0_i32_1 : i32, i32, i32
  }
  func.func @transform_3(%arg0: i32, %arg1: i32, %arg2: i32) -> (i32, i32, i32) {
    %c0_i32 = arith.constant 0 : i32
    %c0_i32_0 = arith.constant 0 : i32
    return %arg0, %arg1, %c0_i32 : i32, i32, i32
  }
}

</mosaic_0001>

<bundles_post_ra>
// kernel: tpu_custom_call.1
= control target key start
LH: loop header
LB: loop body
LE: loop exit
PB: predicated region body
PF: predicated region fallthrough
CT: control target
= control target key end

     0   :  { %8 = vsyncpa [#allocation7], 0  ;;  %s1211_s0 = inlined_call_operand.vmem [shape: f32[2,8,32], index: 0, kind: input, shape index: {}]   ;;  %s1212_s1 = inlined_call_operand.vmem [shape: f32[2,8,32], index: 1, kind: input, shape index: {}]   ;;  %s1213_s2 = inlined_call_operand.vmem [shape: f32[3,32,16], index: 2, kind: input, shape index: {}]   ;;  %s1214_s3 = inlined_call_operand.hbm [shape: f32[2,8,16], index: 3, kind: output, shape index: {}]  }
   0x1   :  { %10 = vsyncpa [#allocation7 + $0x1], 0  ;;  %s1031_s12 = smov 0   ;;  %s1033_s13 = smov 0  }
   0x2   :  { %s1035_s14 = smov 0   ;;  %s1037_s15 = smov 0  }
   0x3   :  { %s1039_s16 = smov 0   ;;  %s1041_s17 = smov 0  }
   0x4 LB: > { %s773_s18 = sadd.s32 4294967295, %s1004_s17   ;;  %s774_s19 = sadd.s32 4294967294, %s1004_s17   ;;  %s1004_s17 = sphi %s1041_s17, %s16_s17   ;;  %s1000_s16 = sphi %s1039_s16, %s1221_s16   ;;  %s996_s15 = sphi %s1037_s15, %s1220_s15   ;;  %s992_s14 = sphi %s1035_s14, %s1219_s14   ;;  %s988_s13 = sphi %s1033_s13, %s1218_s13   ;;  %s984_s12 = sphi %s1031_s12, %s1217_s12  }
   0x5   : > { %s35_s20 = sadd.s32 1, %s1000_s16  ;;  %s121_s21 = sadd.s32 1, %s992_s14 }
   0x6   : > { %p37_p0 = scmp.ge.s32.totalorder %s35_s20, 2  ;;  %p131_p1 = scmp.ne.s32.totalorder %s992_s14, %s988_s13 }
   0x7   : > { %p132_p2 = scmp.eq.s32.totalorder %s773_s18, 1  ;;  %p137_p3 = scmp.ne.s32.totalorder %s988_s13, %s984_s12 }
   0x8   : > { %s1223_s20 = smov (%p37_p0, %s35_s20), 0  ;;  %p138_p5 = scmp.eq.s32.totalorder %s774_s19, 1 }
   0x9   : > { %p1071_p4 = por %p132_p2, %p131_p1  ;;  %s116_s23 = ssub.s32 %s1000_s16, %s1223_s20 }
   0xa   : > { %p777_p6 = scmp.ge.s32.totalorder %s1004_s17, 1  ;;  %p119_p7 = scmp.eq.s32.totalorder %s116_s23, 0 }
   0xb   : > { %p1078_p8 = por %p138_p5, %p137_p3  ;;  %p179_p9 = scmp.lt.s32.totalorder %s1004_s17, 3 }
   0xc   : > { %s1084_s25 = scalar_select %p119_p7, %s992_s14, %s121_s21  }
   0xd   : > { %p180_p10 = pnand %p777_p6, %p179_p9 }
   0xe   : > { %p212_p11 = scmp.lt.s32.totalorder (!%p180_p10), %s996_s15, 1  ;;  %s209_s21 = sand.u32 (!%p180_p10), 1, %s988_s13  }
   0xf   : > { %183 = sbr.rel (%p180_p10) target bundleno = 1008 (0x3f0), region = 32  ;;  %s778_s23 = sshll.u32 (!%p180_p10), %s209_s21, 3 }
  0x10   : > { %s796_s26 = sshll.u32 (!%p180_p10), %s996_s15, 7  ;;  %s670_s5 = scalar_lea.sflag (!%p180_p10), [#allocation7], %s209_s21 }
  0x11   : > { %s682_s4 = scalar_lea.hbm (!%p180_p10), %s1214_s3, %s796_s26 }
  0x14   : > { %v239_v0 = vld [vmem:[%s1213_s2 + $0x18] sm:$0xff]  ;;  %v1006_v2 = vmov 0.0   ;;  %v238_v3 = vld [vmem:[%s1213_s2 + $0x10] sm:$0xff]  ;;  %vm233_vm0 = vcmask 130048   ;;  %s213_s7 = scalar_select %p212_p11, %s996_s15, 1  ;;  %v237_v5 = vld [vmem:[%s1213_s2 + $0x8] sm:$0xff] }
  0x15   : > { %v785_v1 = vld [vmem:[%s1213_s2 + $0x38] sm:$0xff]  ;;  %818 = vmatprep.subr.mxu0 %v1006_v2  ;;  %829 = vmatprep.subr.mxu1 %v1006_v2  ;;  %v784_v4 = vld [vmem:[%s1213_s2 + $0x30] sm:$0xff]  ;;  %234 = vst.msk [vmem:[#allocation5] sm:$0xff] %vm233_vm0, %v1006_v2  ;;  %v783_v6 = vld [vmem:[%s1213_s2 + $0x28] sm:$0xff]  ;;  %vm1007_vm1 = vmmov 0   ;;  %vm240_vm2 = vcmask 261120  }
  0x16   : > { %819 = vmatpush3.msra.mxu0 %v239_v0  ;;  %830 = vmatpush3.msra.mxu1 %v785_v1  ;;  %s779_s18 = sshll.u32 %s213_s7, 3  ;;  %v236_v7 = vld [vmem:[%s1213_s2] sm:$0xff]  ;;  %v790_v16 = vld [vmem:[%s1213_s2 + $0x58] sm:$0xff]  ;;  %v789_v17 = vld [vmem:[%s1213_s2 + $0x50] sm:$0xff]  ;;  %vm230_vm3 = vcmask 7168   ;;  %v1008_v18 = vmov -inf  }
  0x17   : > { %820 = vmatprep.subr.mxu0 %v1006_v2  ;;  %831 = vmatprep.subr.mxu1 %v1006_v2  ;;  %s218_s27 = scalar_lea.vmem %s1211_s0, %s779_s18  ;;  %s225_s30 = scalar_lea.vmem %s1212_s1, %s779_s18  ;;  %v782_v9 = vld [vmem:[%s1213_s2 + $0x20] sm:$0xff]  ;;  %231 = vst.msk [vmem:[#allocation3] sm:$0xff] %vm230_vm3, %v1008_v18  ;;  %232 = vst.msk [vmem:[#allocation4] sm:$0xff] %vm230_vm3, %v1006_v2  ;;  %v788_v19 = vld [vmem:[%s1213_s2 + $0x48] sm:$0xff]  ;;  %vm549_vm4 = vcmask 64512   ;;  %v1009_v24 = vmov 0  }
  0x18   : > { %821 = vmatpush3.msra.mxu0 %v238_v3  ;;  %832 = vmatpush3.msra.mxu1 %v784_v4  ;;  %v235_v8 = vld [vmem:[%s218_s27] sm:$0xff]  ;;  %s211_s27 = scalar_lea.vmem [#allocation6], %s778_s23  ;;  %s1010_s7 = smov [#allocation6]  }
  0x19   : > { %822 = vmatprep.subr.mxu0 %v1006_v2  ;;  %833 = vmatprep.subr.mxu1 %v1006_v2  ;;  %v315_v10 = vld [vmem:[%s225_s30] sm:$0xff]  ;;  %s684_s28 = sshll.u32 %s211_s27, 4  ;;  %s932_s15 = sshll.u32 %s1010_s7, 4  ;;  %s685_s28 = int_to_ptr.vmem [resolvable:$true] %s684_s28  ;;  %s933_s15 = int_to_ptr.vmem [resolvable:$false] %s932_s15 }
  0x1a   : > { %823 = vmatpush3.msra.mxu0 %v237_v5  ;;  %826 = vmatprep.mubr.msk.f32.mxu0 %vm1007_vm1, %v1006_v2  ;;  %v787_v20 = vld [vmem:[%s1213_s2 + $0x40] sm:$0xff]  ;;  %s928_s6 = scalar_lea.vmem %s685_s28, 128  ;;  %s934_s8 = scalar_lea.vmem %s933_s15, 256 }
  0x1b   : > { %824 = vmatprep.subr.mxu0 %v1006_v2  ;;  %834 = vmatpush3.msra.mxu1 %v783_v6  ;;  %p929_p12 = scmp.ne.s32.totalorder %s685_s28, %s928_s6  ;;  %p935_p1 = scmp.lt.s32.totalorder %s685_s28, %s933_s15 }
  0x1c   : > { %825 = vmatpush3.msra.mxu0 %v236_v7  ;;  %835 = vmatprep.subr.mxu1 %v1006_v2  ;;  %v573_v44 = vld [vmem:[#allocation5] sm:$0xff]  ;;  %p936_p2 = scmp.lt.s32.totalorder %s934_s8, %s928_s6 }
  0x1d   : > { %827 = vmatmul.mubr.msk.f32.vlgmr.msra.gmra.mxu0 %vm240_vm2, %v235_v8  ;;  %836 = vmatpush3.msra.mxu1 %v782_v9  ;;  %p930_p13 = pnand %p929_p12, %p1071_p4 }
  0x1e   : > { %837 = vmatprep.mubr.msk.f32.mxu1 %vm1007_vm1, %v1006_v2  ;;  %851 = vmatprep.subr.mxu1 %v1006_v2  ;;  %v548_v25 = vld [vmem:[#allocation3] sm:$0xff]  ;;  %v565_v38 = vld [vmem:[#allocation4] sm:$0xff]  ;;  %p937_p3 = por %p936_p2, %p935_p1 }
  0x1f   : > { %838 = vmatmul.mubr.msk.f32.vlgmr.msra.gmra.mxu1 %vm240_vm2, %v315_v10  ;;  %840 = vmatprep.subr.mxu0 %v1006_v2  ;;  %p931_p0 = pneg %p930_p13 }
  0x20   : > { %853 = vmatprep.mubr.msk.f32.mxu1 %vm1007_vm1, %v1006_v2  ;;  %848 = vmatprep.mubr.msk.f32.mxu0 %vm1007_vm1, %v1006_v2 }
  0x21   : > { %841 = vmatpush3.msra.mxu0 %v790_v16  ;;  %920 = vset.pattern.permute.xlu0 %v1009_v24  ;;  %p938_p5 = pnand %p937_p3, %p931_p0 }
  0x22   : > { %842 = vmatprep.subr.mxu0 %v1006_v2  ;;  %921 = vset.pattern.permute.xlu1 %v1009_v24 }
  0x23   : > { %843 = vmatpush3.msra.mxu0 %v789_v17 }
  0x24   : > { %844 = vmatprep.subr.mxu0 %v1006_v2 }
  0x25   : > { %845 = vmatpush3.msra.mxu0 %v788_v19 }
  0x26   : > { %846 = vmatprep.subr.mxu0 %v1006_v2 }
  0x27   : > { %847 = vmatpush3.msra.mxu0 %v787_v20 }
  0x28   : > { %849 = vmatmul.mubr.msk.f32.vlgmr.msra.gmra.mxu0 %vm240_vm2, %v315_v10 }
  0xdd   : > { %v310_v11 = vpop.f32.mrf.mxu0 }
  0xde   : > { %314 = vst.msk [vmem:[#allocation2] sm:$0xff] %vm233_vm0, %v310_v11 }
  0xdf   : > { %v828_v12 = vpop.f32.mrf.mxu0  ;;  %v391_v13 = vpop.f32.mrf.mxu1 }
  0xe0   : > { %852 = vmatpush3.xpose.msk.msra.mxu1 %vm233_vm0, %v391_v13 }
  0xe1   : > { %v839_v14 = vpop.f32.mrf.mxu1  ;;  %856 = vmatprep.subr.mxu1 %v1006_v2 }
  0xe5   : > { %v470_v15 = vld [vmem:[#allocation2] sm:$0xff] }
  0xe6   : > { %854 = vmatmul.mubr.msk.f32.vlgmr.msra.gmra.mxu1 %vm233_vm0, %v470_v15 }
  0xe7   : > { %858 = vmatprep.mubr.msk.f32.mxu1 %vm1007_vm1, %v1006_v2 }
  0xe8   : > { %v466_v29 = vpop.f32.mrf.mxu0 }
  0xe9   : > { %857 = vmatpush3.msra.mxu1 %v466_v29 }
  0xea   : > { %v850_v30 = vpop.f32.mrf.mxu0 }
 0x1a6   : > { %v544_v21 = vpop.f32.mrf.mxu1 }
 0x1a7   : > { %v550_v22 = vsel %vm549_vm4, %v544_v21, -inf }
 0x1a8   : > { %551 = vmax.xlane.f32.xlu0 %v550_v22  ;;  %v855_v23 = vpop.f32.mrf.mxu1 }
 0x231   : > { %v552_v26 = vpop.xlane.xlu0 %551 }
 0x232   : > { %v553_v27 = vmax.f32 %v548_v25, %v552_v26 }
 0x234   : > { %v554_v28 = vsub.f32 %v548_v25, %v553_v27  ;;  %655 = vst.msk [vmem:[#allocation3] sm:$0xff] %vm230_vm3, %v553_v27  ;;  %559 = vperm.xlu0 %920, %v553_v27  }
 0x236   : > { %v555_v35 = vmul.f32 1.442695, %v554_v28 }
 0x2af   : > { %v560_v31 = vpop.permute.xlu0 %559 }
 0x2b0   : > { %v562_v32 = vsub.f32 %v544_v21, %v560_v31 }
 0x2b2   : > { %v563_v33 = vmul.f32 1.442695, %v562_v32 }
 0x2b4   : > { %922 = vpow2.f32 %v563_v33 }
 0x2b5   : > { %924 = vpow2.f32 %v555_v35 }
 0x2c1   : > { %v923_v34 = vpop.eup %922 }
 0x2c2   : > { %859 = vmatmul.mubr.msk.f32.vlgmr.msra.gmra.mxu1 %vm549_vm4, %v923_v34  ;;  %v567_v36 = vsel %vm549_vm4, %v923_v34, 0.0  ;;  %v925_v37 = vpop.eup %924 }
 0x2c3   : > { %568 = vadd.xlane.f32.xlu1 %v567_v36  ;;  %v566_v39 = vmul.f32 %v925_v37, %v565_v38 }
 0x2d4   : > { %576 = vperm.xlu1 %921, %v925_v37  }
 0x34c   : > { %v569_v40 = vpop.xlane.xlu1 %568 }
 0x34d   : > { %v570_v41 = vadd.f32 %v569_v40, %v566_v39 }
 0x34f   : > { %572 = vst.msk [vmem:[#allocation4] sm:$0xff] %vm230_vm3, %v570_v41 }
 0x350   : > { %v577_v45 = vpop.permute.xlu1 %576 }
 0x351   : > { %v579_v46 = vmul.f32 %v577_v45, %v573_v44 }
 0x356   : > { %v659_v42 = vld [vmem:[#allocation4] sm:$0xff] }
 0x357   : > { %926 = vrcp.f32 %v659_v42 }
 0x364   : > { %v927_v43 = vpop.eup %926 }
 0x365   : > { %664 = vperm.xlu1 %921, %v927_v43  }
 0x382   : > { %v649_v47 = vpop.f32.mrf.mxu1 }
 0x383   : > { %v653_v48 = vadd.f32 %v649_v47, %v579_v46 }
 0x384   : > { %v860_v49 = vpop.f32.mrf.mxu1 }
 0x385   : > { %654 = vst.msk [vmem:[#allocation5] sm:$0xff] %vm233_vm0, %v653_v48 }
 0x38c   : > { %v661_v51 = vld [vmem:[#allocation5] sm:$0xff] }
 0x3e0   : > { %v665_v50 = vpop.permute.xlu1 %664 }
 0x3e1   : > { %v667_v52 = vmul.f32 %v665_v50, %v661_v51 }
 0x3e3   : > { %668 = vst.msk [vmem:[%s211_s27] sm:$0xff] %vm233_vm0, %v667_v52 }
 0x3e4   : > { %941 = shalt.err (!%p938_p5)
}
 0x3e5   : > { %s942_s9 = scalar_lea.hbm %s682_s4, 128  ;;  %s946_s18 = scalar_lea.hbm %s1214_s3, 256 }
 0x3e6   : > { %p943_p6 = scmp.ne.s32.totalorder %s682_s4, %s942_s9  ;;  %p947_p10 = scmp.lt.s32.totalorder %s682_s4, %s1214_s3 }
 0x3e7   : > { %p948_p11 = scmp.lt.s32.totalorder %s946_s18, %s942_s9 }
 0x3e8   : > { %p944_p7 = pnand %p943_p6, %p1071_p4 }
 0x3e9   : > { %p949_p12 = por %p948_p11, %p947_p10 }
 0x3ea   : > { %p945_p9 = pneg %p944_p7 }
 0x3ec   : > { %p950_p13 = pnand %p949_p12, %p945_p9 }
 0x3ee   : > { %953 = shalt.err (!%p950_p13)
}
 0x3ef   : > { %861 = dma.vmem_to_hbm [thread:$0]  (%p1071_p4), %s685_s28, 128, %s682_s4, %s670_s5  }
 0x3f0 PF: > { %p867_p0 = scmp.ge.s32.totalorder %s1004_s17, 2  ;;  %s696_s23 = sand.u32 1, %s984_s12  }
 0x3f1   : > { %s697_s26 = scalar_lea.sflag [#allocation7], %s696_s23 }
 0x3f2   : > { %p864_p1 = pnand %p867_p0, %p1078_p8 }
 0x3f4   : > { %p865_p2 = pneg %p864_p1 }
 0x3f6   : > { %979 = dma.done.wait (%p865_p2), %s697_s26, 128  }
 0x3f7   : > { %981 = vsyncadd (%p865_p2), %s697_s26, 4294967168  ;;  %s16_s17 = sadd.s32 1, %s1004_s17   ;;  %s1217_s12 = smov %s988_s13 }
 0x3f8   : > { %p13_p3 = scmp.ge.s32.totalorder %s16_s17, 4   ;;  %s1218_s13 = smov %s992_s14 }
 0x3f9   : > { %s1219_s14 = smov %s1084_s25  ;;  %s1220_s15 = smov %s1000_s16 }
 0x3fa   : > { %s1221_s16 = smov %s1223_s20  ;;  %15 = sbr.rel (!%p13_p3) target bundleno = 4 (0x4), region = 80 }
 0x3ff   :  { %702 = vsyncpa [#allocation7], 1 }
 0x400   :  { %704 = vsyncpa [#allocation7 + $0x1], 1 }

</bundles_post_ra>
